<compile_context>
chip_gen: v5e
topology: v5e:2x2
jax: 0.10.0
libtpu: 0.0.40
codegen_flags: <defaults>
</compile_context>

<pallas_src>
import functools
import numpy as np
import jax
import jax.numpy as jnp
from jax.experimental import pallas as pl
from jax.experimental.pallas import tpu as pltpu


def _cdiv(a, b):
    return (a + b - 1) // b


def _round_up(a, b):
    return _cdiv(a, b) * b


# ----------------------------------------------------------------------------
# Parameters: PyTorch nn.Linear-style init for the k and v heads, plus the
# one-time fused packing (done offline, not per call).
# ----------------------------------------------------------------------------
def make_params(key, num_input, hidden_size, *, fused_dtype=jnp.float32):
    kk_w, kk_b, kv_w, kv_b = jax.random.split(key, 4)
    bound = 1.0 / float(np.sqrt(num_input))
    wk = jax.random.uniform(kk_w, (hidden_size, num_input), jnp.float32, -bound, bound)
    bk = jax.random.uniform(kk_b, (hidden_size,), jnp.float32, -bound, bound)
    wv = jax.random.uniform(kv_w, (hidden_size, num_input), jnp.float32, -bound, bound)
    bv = jax.random.uniform(kv_b, (hidden_size,), jnp.float32, -bound, bound)
    return dict(
        # original (PyTorch-layout) weights kept only for the pure-JAX reference
        wk=wk, bk=bk, wv=wv, bv=bv,
        # fused, pre-transposed parameters consumed by the kernel.
        # fused_dtype=jnp.bfloat16 halves HBM traffic (accumulation stays f32).
        w_fused=jnp.concatenate([wk.T, wv.T], axis=1).astype(fused_dtype),  # (D, 2H)
        b_fused=jnp.concatenate([bk, bv])[None, :].astype(fused_dtype),     # (1, 2H)
    )


# ----------------------------------------------------------------------------
# Pallas kernel: one lane-dense matmul producing the [k | v] output slab.
# ----------------------------------------------------------------------------
def _attn_transform_kernel(x_ref, w_ref, b_ref, out_ref, *, precision):
    out_ref[...] = (
        jnp.dot(x_ref[...], w_ref[...],
                preferred_element_type=jnp.float32,
                precision=precision)
        + b_ref[...].astype(jnp.float32)
    ).astype(out_ref.dtype)


# ----------------------------------------------------------------------------
# Device-aware tiling helpers.
# ----------------------------------------------------------------------------
def _device_info():
    """Best-effort (vmem_capacity_bytes, num_tensorcores_per_chip)."""
    kind = ""
    try:
        kind = jax.devices()[0].device_kind.lower()
    except Exception:
        pass
    try:
        vmem_cap = int(pltpu.get_tpu_info().vmem_capacity_bytes)
    except Exception:
        vmem_cap = (64 << 20) if "7" in kind else (128 << 20)
    # v7x (and v4/v5p megacore) have 2 TensorCores per chip; v5e/v6e have 1.
    num_tc = 2 if ("7" in kind or "v4" in kind or "v5p" in kind) else 1
    return vmem_cap, num_tc


_SINGLE_BUFFER_WEIGHT_MIN_BYTES = 2 << 20


def _resident_spec(shape, nbytes):
    """BlockSpec for a grid-invariant input (constant index_map -> fetched once).

    For large weights, request a single buffer instead of the default
    double-buffer: saves one full weight copy of VMEM (matters on v7x's
    64 MiB at production D).  Tiny weights keep the default path.
    """
    if nbytes >= _SINGLE_BUFFER_WEIGHT_MIN_BYTES and hasattr(pl, "Buffered"):
        try:
            return pl.BlockSpec(shape, lambda i: (0, 0), pipeline_mode=pl.Buffered(1))
        except TypeError:  # BlockSpec without pipeline_mode support
            pass
    return pl.BlockSpec(shape, lambda i: (0, 0))


# ----------------------------------------------------------------------------
# Forward wrapper.
# ----------------------------------------------------------------------------
def attention_transform_forward(x, params, *, batch_tile=None, return_fused=False,
                                precision=None):
    """AttentionTransform.forward.

    Returns (k, v) by default; with return_fused=True returns the (B, 2H)
    slab [k | v] (skips two wrapper-side slice round-trips through HBM).
    """
    B, D = x.shape
    w = params["w_fused"]
    b = params["b_fused"]
    H2 = w.shape[1]
    H = H2 // 2

    x_item = jnp.dtype(x.dtype).itemsize
    w_item = jnp.dtype(w.dtype).itemsize
    out_item = 4  # f32 output slab

    vmem_cap, num_tc = _device_info()

    # ---- batch-tile selection -------------------------------------------
    # Kernel is HBM/overhead bound (K=D is tiny): pick the biggest tile that
    # fits the VMEM budget, and keep >= 2 parallel tiles on 2-TC chips.
    w_alloc = D * H2 * w_item
    b_alloc = H2 * w_item
    per_row = 2 * (D * x_item + H2 * out_item)     # x + out, double-buffered
    budget = vmem_cap // 2                          # headroom for compiler scratch
    tb_max = max(8, ((budget - 2 * (w_alloc + b_alloc)) // per_row) // 8 * 8)

    default_cap = 1024 if vmem_cap <= (64 << 20) else 2048   # v7x vs v5e/v6e
    cap = batch_tile if batch_tile is not None else default_cap
    cap = max(8, min(cap, tb_max) // 8 * 8)

    B_pad8 = _round_up(B, 8)
    if num_tc >= 2 and B_pad8 >= 16:
        # Ensure the "parallel" grid axis has >= 2 tiles so both TCs work.
        cap = min(cap, _round_up(_cdiv(B_pad8, num_tc), 8))

    n_tiles = _cdiv(B_pad8, cap)
    tb = _round_up(_cdiv(B_pad8, n_tiles), 8)       # always a multiple of 8, <= cap
    B_total = n_tiles * tb                          # padding is < 8 * n_tiles rows

    if B_total != B:
        x = jnp.pad(x, ((0, B_total - B), (0, 0)))

    needed = per_row * tb + 2 * (w_alloc + b_alloc)
    vmem_limit = int(min(int(vmem_cap * 0.75), max(2 * needed, 32 << 20)))
    vmem_limit = max(vmem_limit, needed + (1 << 20))

    cost = pl.CostEstimate(
        flops=2 * B_total * D * H2,
        transcendentals=0,
        bytes_accessed=(B_total * D * x_item + w_alloc + b_alloc
                        + B_total * H2 * out_item),
    )

    out = pl.pallas_call(
        functools.partial(_attn_transform_kernel, precision=precision),
        out_shape=jax.ShapeDtypeStruct((B_total, H2), jnp.float32),
        grid=(n_tiles,),
        in_specs=[
            pl.BlockSpec((tb, D), lambda i: (i, 0)),   # batch-sharded x tile
            _resident_spec((D, H2), w_alloc),          # fused [Wk^T | Wv^T]
            _resident_spec((1, H2), b_alloc),          # fused [bk | bv]
        ],
        out_specs=pl.BlockSpec((tb, H2), lambda i: (i, 0)),  # lane-dense slab
        compiler_params=pltpu.CompilerParams(
            dimension_semantics=("parallel",),
            vmem_limit_bytes=vmem_limit),
        cost_estimate=cost,
    )(x, w, b)

    if B_total != B:
        out = out[:B]
    if return_fused:
        return out
    return out[:, :H], out[:, H:]


# pure-JAX reference (original, unfused semantics)
def attention_transform_ref(x, params):
    k = x @ params["wk"].T + params["bk"]
    v = x @ params["wv"].T + params["bv"]
    return k, v


if __name__ == "__main__":
    root = jax.random.PRNGKey(0)
    k_params, k_x1, k_x2 = jax.random.split(root, 3)

    # num_input=16, hidden_size=64 -> fused output width 2H = 128 lanes.
    D, H = 16, 64
    params = make_params(k_params, num_input=D, hidden_size=H)

    # Case 1: B=256 — one big tile (or two parallel tiles on 2-TC chips).
    B1 = 256
    x1 = jax.random.normal(k_x1, (B1, D), dtype=jnp.float32)
    k1, v1 = attention_transform_forward(x1, params)
    jax.block_until_ready((k1, v1))
    kr1, vr1 = attention_transform_ref(x1, params)
    assert k1.shape == (B1, H) and v1.shape == (B1, H)
    np.testing.assert_allclose(np.asarray(k1), np.asarray(kr1), rtol=1e-5, atol=1e-5)
    np.testing.assert_allclose(np.asarray(v1), np.asarray(vr1), rtol=1e-5, atol=1e-5)

    # Case 2: awkward batch + forced small tile — exercises the robust
    # pad-to-tile / cdiv-grid path that replaced the degenerate tb-halving loop.
    B2 = 100
    x2 = jax.random.normal(k_x2, (B2, D), dtype=jnp.float32)
    k2, v2 = attention_transform_forward(x2, params, batch_tile=64)
    jax.block_until_ready((k2, v2))
    kr2, vr2 = attention_transform_ref(x2, params)
    assert k2.shape == (B2, H) and v2.shape == (B2, H)
    np.testing.assert_allclose(np.asarray(k2), np.asarray(kr2), rtol=1e-5, atol=1e-5)
    np.testing.assert_allclose(np.asarray(v2), np.asarray(vr2), rtol=1e-5, atol=1e-5)

    # Case 3: fused-slab output path (no wrapper k/v slices).
    kv_slab = attention_transform_forward(x1, params, return_fused=True)
    jax.block_until_ready(kv_slab)
    np.testing.assert_allclose(np.asarray(kv_slab[:, :H]), np.asarray(kr1),
                               rtol=1e-5, atol=1e-5)
    np.testing.assert_allclose(np.asarray(kv_slab[:, H:]), np.asarray(vr1),
                               rtol=1e-5, atol=1e-5)

    print("KERNEL_OK")
</pallas_src>

<mosaic_0001>
module attributes {stable_mosaic.version = 11 : i64} {
  func.func @_attn_transform_kernel(%arg0: i32, %arg1: memref<256x16xf32, #tpu.memory_space<vmem>>, %arg2: memref<16x128xf32, #tpu.memory_space<vmem>>, %arg3: memref<1x128xf32, #tpu.memory_space<vmem>>, %arg4: memref<256x128xf32, #tpu.memory_space<vmem>>) attributes {dimension_semantics = [#tpu.dimension_semantics<parallel>], iteration_bounds = array<i64: 1>, scalar_prefetch = 0 : i64, scratch_operands = 0 : i64, tpu.core_type = #tpu.core_type<tc>, window_params = [{transform_indices = @transform_0, window_bounds = array<i64: 256, 16>}, {pipeline_mode = #tpu.pipeline_mode<synchronous>, transform_indices = @transform_1, window_bounds = array<i64: 16, 128>}, {pipeline_mode = #tpu.pipeline_mode<synchronous>, transform_indices = @transform_2, window_bounds = array<i64: 1, 128>}, {transform_indices = @transform_3, window_bounds = array<i64: 256, 128>}]} {
    %c0 = arith.constant 0 : index
    %c0_0 = arith.constant 0 : index
    %0 = vector.load %arg1[%c0, %c0_0] : memref<256x16xf32, #tpu.memory_space<vmem>>, vector<256x16xf32>
    %c0_1 = arith.constant 0 : index
    %c0_2 = arith.constant 0 : index
    %1 = vector.load %arg2[%c0_1, %c0_2] : memref<16x128xf32, #tpu.memory_space<vmem>>, vector<16x128xf32>
    %cst = arith.constant dense<0.000000e+00> : vector<256x128xf32>
    %2 = tpu.matmul %0, %1, %cst {dimension_numbers = #tpu.dot_dimension_numbers<[1], [0], [0], [1], [0, 0, 1, 1], [], []>} : vector<256x16xf32>, vector<16x128xf32>, vector<256x128xf32> -> vector<256x128xf32>
    %c0_3 = arith.constant 0 : index
    %c0_4 = arith.constant 0 : index
    %3 = vector.load %arg3[%c0_3, %c0_4] : memref<1x128xf32, #tpu.memory_space<vmem>>, vector<1x128xf32>
    %4 = vector.broadcast %3 : vector<1x128xf32> to vector<256x128xf32>
    %5 = arith.addf %2, %4 : vector<256x128xf32>
    %c0_5 = arith.constant 0 : index
    %c0_6 = arith.constant 0 : index
    %6 = vector.load %arg4[%c0_5, %c0_6] : memref<256x128xf32, #tpu.memory_space<vmem>>, vector<256x128xf32>
    tpu.vector_store %arg4[%c0_5, %c0_6], %5 {strides = array<i32>} : memref<256x128xf32, #tpu.memory_space<vmem>>, vector<256x128xf32>,
    return
  }
  func.func @transform_0(%arg0: i32) -> (i32, i32) {
    %c0_i32 = arith.constant 0 : i32
    %c0_i32_0 = arith.constant 0 : i32
    return %arg0, %c0_i32 : i32, i32
  }
  func.func @transform_1(%arg0: i32) -> (i32, i32) {
    %c0_i32 = arith.constant 0 : i32
    %c0_i32_0 = arith.constant 0 : i32
    %c0_i32_1 = arith.constant 0 : i32
    return %c0_i32, %c0_i32_0 : i32, i32
  }
  func.func @transform_2(%arg0: i32) -> (i32, i32) {
    %c0_i32 = arith.constant 0 : i32
    %c0_i32_0 = arith.constant 0 : i32
    %c0_i32_1 = arith.constant 0 : i32
    return %c0_i32, %c0_i32_0 : i32, i32
  }
  func.func @transform_3(%arg0: i32) -> (i32, i32) {
    %c0_i32 = arith.constant 0 : i32
    %c0_i32_0 = arith.constant 0 : i32
    return %arg0, %c0_i32 : i32, i32
  }
}

</mosaic_0001>

<bundles_post_ra>
// kernel: tpu_custom_call.1
= control target key start
LH: loop header
LB: loop body
LE: loop exit
PB: predicated region body
PF: predicated region fallthrough
CT: control target
= control target key end

     0   :  { %vm53_vm0 = vcmask 130048   ;;  %s578_s0 = inlined_call_operand.vmem [shape: f32[256,16], index: 0, kind: input, shape index: {}]   ;;  %s579_s1 = inlined_call_operand.vmem [shape: f32[16,128], index: 1, kind: input, shape index: {}]   ;;  %s580_s2 = inlined_call_operand.vmem [shape: f32[1,128], index: 2, kind: input, shape index: {}]   ;;  %s581_s3 = inlined_call_operand.hbm [shape: f32[256,128], index: 3, kind: output, shape index: {}]  }
   0x1   :  { %v48_v0 = vld [vmem:[%s579_s1 + $0x8] sm:$0xff]  ;;  %v47_v1 = vld [vmem:[%s579_s1] sm:$0xff] }
   0x2   :  { %346 = vmatpush.msra.mxu2 %v48_v0  ;;  %347 = vmatpush.msra.mxu3 %v48_v0  ;;  %v31_v2 = vld [vmem:[%s578_s0 + $0x80] sm:$0xff] }
   0x3   :  { %v39_v3 = vld [vmem:[%s578_s0 + $0xc0] sm:$0xff]  ;;  %164 = vmatpush.msra.mxu0 %v48_v0  ;;  %345 = vmatpush.msra.mxu1 %v48_v0 }
   0x4   :  { %349 = vmatpush.msra.mxu2 %v47_v1  ;;  %350 = vmatpush.msra.mxu3 %v47_v1  ;;  %v15_v4 = vld [vmem:[%s578_s0] sm:$0xff] }
   0x5   :  { %v23_v5 = vld [vmem:[%s578_s0 + $0x40] sm:$0xff]  ;;  %329 = vmatmul.msk.f32.vlgmr.msra.gmra.mxu2 %vm53_vm0, %v31_v2  ;;  %337 = vmatmul.msk.f32.vlgmr.msra.gmra.mxu3 %vm53_vm0, %v39_v3 }
   0x6   :  { %165 = vmatpush.msra.mxu0 %v47_v1  ;;  %348 = vmatpush.msra.mxu1 %v47_v1 }
   0x7   :  { %313 = vmatmul.msk.f32.vlgmr.msra.gmra.mxu0 %vm53_vm0, %v15_v4  ;;  %321 = vmatmul.msk.f32.vlgmr.msra.gmra.mxu1 %vm53_vm0, %v23_v5 }
   0x8   :  { %8 = vsyncpa [#allocation3], 0  ;;  %v32_v6 = vld [vmem:[%s578_s0 + $0x88] sm:$0xff]  ;;  %v33_v10 = vld [vmem:[%s578_s0 + $0x90] sm:$0xff]  ;;  %s301_s27 = sshll.u32 %s581_s3, 4  ;;  %s382_s28 = smov 128   ;;  %s302_s27 = int_to_ptr.hbm [resolvable:$true] %s301_s27 }
   0x9   :  { %v40_v7 = vld [vmem:[%s578_s0 + $0xc8] sm:$0xff]  ;;  %v41_v11 = vld [vmem:[%s578_s0 + $0xd0] sm:$0xff]  ;;  %v34_v14 = vld [vmem:[%s578_s0 + $0x98] sm:$0xff]  ;;  %s383_s29 = smov 8  }
   0xa   :  { %v16_v8 = vld [vmem:[%s578_s0 + $0x8] sm:$0xff]  ;;  %v17_v12 = vld [vmem:[%s578_s0 + $0x10] sm:$0xff]  ;;  %v42_v15 = vld [vmem:[%s578_s0 + $0xd8] sm:$0xff] }
   0xb   :  { %v24_v9 = vld [vmem:[%s578_s0 + $0x48] sm:$0xff]  ;;  %v25_v13 = vld [vmem:[%s578_s0 + $0x50] sm:$0xff]  ;;  %v18_v16 = vld [vmem:[%s578_s0 + $0x18] sm:$0xff] }
   0xc   :  { %v26_v17 = vld [vmem:[%s578_s0 + $0x58] sm:$0xff]  ;;  %v35_v18 = vld [vmem:[%s578_s0 + $0xa0] sm:$0xff]  ;;  %v36_v22 = vld [vmem:[%s578_s0 + $0xa8] sm:$0xff] }
   0xd   :  { %330 = vmatmul.msk.f32.gmra.mxu2 %vm53_vm0, %v32_v6  ;;  %338 = vmatmul.msk.f32.gmra.mxu3 %vm53_vm0, %v40_v7  ;;  %v43_v19 = vld [vmem:[%s578_s0 + $0xe0] sm:$0xff]  ;;  %v44_v23 = vld [vmem:[%s578_s0 + $0xe8] sm:$0xff]  ;;  %v37_v26 = vld [vmem:[%s578_s0 + $0xb0] sm:$0xff] }
   0xe   :  { %v19_v20 = vld [vmem:[%s578_s0 + $0x20] sm:$0xff]  ;;  %v20_v24 = vld [vmem:[%s578_s0 + $0x28] sm:$0xff]  ;;  %v45_v27 = vld [vmem:[%s578_s0 + $0xf0] sm:$0xff] }
   0xf   :  { %314 = vmatmul.msk.f32.gmra.mxu0 %vm53_vm0, %v16_v8  ;;  %322 = vmatmul.msk.f32.gmra.mxu1 %vm53_vm0, %v24_v9  ;;  %v27_v21 = vld [vmem:[%s578_s0 + $0x60] sm:$0xff]  ;;  %v28_v25 = vld [vmem:[%s578_s0 + $0x68] sm:$0xff]  ;;  %v21_v28 = vld [vmem:[%s578_s0 + $0x30] sm:$0xff] }
  0x10   :  { %v29_v29 = vld [vmem:[%s578_s0 + $0x70] sm:$0xff]  ;;  %v38_v30 = vld [vmem:[%s578_s0 + $0xb8] sm:$0xff]  ;;  %v541_v34 = vld [vmem:[%s580_s2] ss:$0 sm:$0xff] }
  0x11   :  { %v46_v31 = vld [vmem:[%s578_s0 + $0xf8] sm:$0xff] }
  0x12   :  { %v22_v32 = vld [vmem:[%s578_s0 + $0x38] sm:$0xff] }
  0x13   :  { %v30_v33 = vld [vmem:[%s578_s0 + $0x78] sm:$0xff]  ;;  %s381_s0 = smov [#allocation2]  }
  0x14   :  { %s299_s2 = sshll.u32 %s381_s0, 4  ;;  %s300_s2 = int_to_ptr.vmem [resolvable:$true] %s299_s2 }
  0x15   :  { %331 = vmatmul.msk.f32.gmra.mxu2 %vm53_vm0, %v33_v10  ;;  %339 = vmatmul.msk.f32.gmra.mxu3 %vm53_vm0, %v41_v11 }
  0x17   :  { %315 = vmatmul.msk.f32.gmra.mxu0 %vm53_vm0, %v17_v12  ;;  %323 = vmatmul.msk.f32.gmra.mxu1 %vm53_vm0, %v25_v13 }
  0x1d   :  { %332 = vmatmul.msk.f32.gmra.mxu2 %vm53_vm0, %v34_v14  ;;  %340 = vmatmul.msk.f32.gmra.mxu3 %vm53_vm0, %v42_v15 }
  0x1f   :  { %316 = vmatmul.msk.f32.gmra.mxu0 %vm53_vm0, %v18_v16  ;;  %324 = vmatmul.msk.f32.gmra.mxu1 %vm53_vm0, %v26_v17 }
  0x25   :  { %333 = vmatmul.msk.f32.gmra.mxu2 %vm53_vm0, %v35_v18  ;;  %341 = vmatmul.msk.f32.gmra.mxu3 %vm53_vm0, %v43_v19 }
  0x27   :  { %317 = vmatmul.msk.f32.gmra.mxu0 %vm53_vm0, %v19_v20  ;;  %325 = vmatmul.msk.f32.gmra.mxu1 %vm53_vm0, %v27_v21 }
  0x2d   :  { %334 = vmatmul.msk.f32.gmra.mxu2 %vm53_vm0, %v36_v22  ;;  %342 = vmatmul.msk.f32.gmra.mxu3 %vm53_vm0, %v44_v23 }
  0x2f   :  { %318 = vmatmul.msk.f32.gmra.mxu0 %vm53_vm0, %v20_v24  ;;  %326 = vmatmul.msk.f32.gmra.mxu1 %vm53_vm0, %v28_v25 }
  0x35   :  { %335 = vmatmul.msk.f32.gmra.mxu2 %vm53_vm0, %v37_v26  ;;  %343 = vmatmul.msk.f32.gmra.mxu3 %vm53_vm0, %v45_v27 }
  0x37   :  { %319 = vmatmul.msk.f32.gmra.mxu0 %vm53_vm0, %v21_v28  ;;  %327 = vmatmul.msk.f32.gmra.mxu1 %vm53_vm0, %v29_v29 }
  0x3d   :  { %336 = vmatmul.msk.f32.gmra.mxu2 %vm53_vm0, %v38_v30  ;;  %344 = vmatmul.msk.f32.gmra.mxu3 %vm53_vm0, %v46_v31 }
  0x3f   :  { %320 = vmatmul.msk.f32.gmra.mxu0 %vm53_vm0, %v22_v32  ;;  %328 = vmatmul.msk.f32.gmra.mxu1 %vm53_vm0, %v30_v33 }
  0x84   :  { %v167_v35 = vpop.f32.mrf.mxu0  ;;  %v191_v36 = vpop.f32.mrf.mxu1 }
  0x85   :  { %v168_v37 = vadd.f32 %v541_v34, %v167_v35  ;;  %v192_v38 = vadd.f32 %v541_v34, %v191_v36 }
  0x87   :  { %263 = vst [vmem:[#allocation2] sm:$0xff] %v168_v37 }
  0x88   :  { %271 = vst [vmem:[#allocation2 + $0x40] sm:$0xff] %v192_v38  ;;  %v215_v39 = vpop.f32.mrf.mxu2  ;;  %v239_v40 = vpop.f32.mrf.mxu3 }
  0x89   :  { %v216_v41 = vadd.f32 %v541_v34, %v215_v39  ;;  %v240_v42 = vadd.f32 %v541_v34, %v239_v40 }
  0x8b   :  { %279 = vst [vmem:[#allocation2 + $0x80] sm:$0xff] %v216_v41 }
  0x8c   :  { %287 = vst [vmem:[#allocation2 + $0xc0] sm:$0xff] %v240_v42  ;;  %v170_v43 = vpop.f32.mrf.mxu0  ;;  %v194_v44 = vpop.f32.mrf.mxu1 }
  0x8d   :  { %v171_v45 = vadd.f32 %v541_v34, %v170_v43  ;;  %v195_v46 = vadd.f32 %v541_v34, %v194_v44 }
  0x8f   :  { %264 = vst [vmem:[#allocation2 + $0x8] sm:$0xff] %v171_v45 }
  0x90   :  { %272 = vst [vmem:[#allocation2 + $0x48] sm:$0xff] %v195_v46  ;;  %v218_v47 = vpop.f32.mrf.mxu2  ;;  %v242_v48 = vpop.f32.mrf.mxu3 }
  0x91   :  { %v219_v49 = vadd.f32 %v541_v34, %v218_v47  ;;  %v243_v50 = vadd.f32 %v541_v34, %v242_v48 }
  0x93   :  { %280 = vst [vmem:[#allocation2 + $0x88] sm:$0xff] %v219_v49 }
  0x94   :  { %288 = vst [vmem:[#allocation2 + $0xc8] sm:$0xff] %v243_v50  ;;  %v173_v51 = vpop.f32.mrf.mxu0  ;;  %v197_v52 = vpop.f32.mrf.mxu1 }
  0x95   :  { %v174_v53 = vadd.f32 %v541_v34, %v173_v51  ;;  %v198_v54 = vadd.f32 %v541_v34, %v197_v52 }
  0x97   :  { %265 = vst [vmem:[#allocation2 + $0x10] sm:$0xff] %v174_v53 }
  0x98   :  { %273 = vst [vmem:[#allocation2 + $0x50] sm:$0xff] %v198_v54  ;;  %v221_v55 = vpop.f32.mrf.mxu2  ;;  %v245_v56 = vpop.f32.mrf.mxu3 }
  0x99   :  { %v222_v57 = vadd.f32 %v541_v34, %v221_v55  ;;  %v246_v58 = vadd.f32 %v541_v34, %v245_v56 }
  0x9b   :  { %281 = vst [vmem:[#allocation2 + $0x90] sm:$0xff] %v222_v57 }
  0x9c   :  { %289 = vst [vmem:[#allocation2 + $0xd0] sm:$0xff] %v246_v58  ;;  %v176_v59 = vpop.f32.mrf.mxu0  ;;  %v200_v60 = vpop.f32.mrf.mxu1 }
  0x9d   :  { %v177_v61 = vadd.f32 %v541_v34, %v176_v59  ;;  %v201_v62 = vadd.f32 %v541_v34, %v200_v60 }
  0x9f   :  { %266 = vst [vmem:[#allocation2 + $0x18] sm:$0xff] %v177_v61 }
  0xa0   :  { %274 = vst [vmem:[#allocation2 + $0x58] sm:$0xff] %v201_v62  ;;  %v224_v63 = vpop.f32.mrf.mxu2  ;;  %v248_v0 = vpop.f32.mrf.mxu3 }
  0xa1   :  { %v225_v1 = vadd.f32 %v541_v34, %v224_v63  ;;  %v249_v2 = vadd.f32 %v541_v34, %v248_v0 }
  0xa3   :  { %282 = vst [vmem:[#allocation2 + $0x98] sm:$0xff] %v225_v1 }
  0xa4   :  { %290 = vst [vmem:[#allocation2 + $0xd8] sm:$0xff] %v249_v2  ;;  %v179_v3 = vpop.f32.mrf.mxu0  ;;  %v203_v4 = vpop.f32.mrf.mxu1 }
  0xa5   :  { %v180_v5 = vadd.f32 %v541_v34, %v179_v3  ;;  %v204_v6 = vadd.f32 %v541_v34, %v203_v4 }
  0xa7   :  { %267 = vst [vmem:[#allocation2 + $0x20] sm:$0xff] %v180_v5 }
  0xa8   :  { %275 = vst [vmem:[#allocation2 + $0x60] sm:$0xff] %v204_v6  ;;  %v227_v7 = vpop.f32.mrf.mxu2  ;;  %v251_v8 = vpop.f32.mrf.mxu3 }
  0xa9   :  { %v228_v9 = vadd.f32 %v541_v34, %v227_v7  ;;  %v252_v10 = vadd.f32 %v541_v34, %v251_v8 }
  0xab   :  { %283 = vst [vmem:[#allocation2 + $0xa0] sm:$0xff] %v228_v9 }
  0xac   :  { %291 = vst [vmem:[#allocation2 + $0xe0] sm:$0xff] %v252_v10  ;;  %v182_v11 = vpop.f32.mrf.mxu0  ;;  %v206_v12 = vpop.f32.mrf.mxu1 }
  0xad   :  { %v183_v13 = vadd.f32 %v541_v34, %v182_v11  ;;  %v207_v14 = vadd.f32 %v541_v34, %v206_v12 }
  0xaf   :  { %268 = vst [vmem:[#allocation2 + $0x28] sm:$0xff] %v183_v13 }
  0xb0   :  { %276 = vst [vmem:[#allocation2 + $0x68] sm:$0xff] %v207_v14  ;;  %v230_v15 = vpop.f32.mrf.mxu2  ;;  %v254_v16 = vpop.f32.mrf.mxu3 }
  0xb1   :  { %v231_v17 = vadd.f32 %v541_v34, %v230_v15  ;;  %v255_v18 = vadd.f32 %v541_v34, %v254_v16 }
  0xb3   :  { %284 = vst [vmem:[#allocation2 + $0xa8] sm:$0xff] %v231_v17 }
  0xb4   :  { %292 = vst [vmem:[#allocation2 + $0xe8] sm:$0xff] %v255_v18  ;;  %v185_v19 = vpop.f32.mrf.mxu0  ;;  %v209_v20 = vpop.f32.mrf.mxu1 }
  0xb5   :  { %v186_v21 = vadd.f32 %v541_v34, %v185_v19  ;;  %v210_v22 = vadd.f32 %v541_v34, %v209_v20 }
  0xb7   :  { %269 = vst [vmem:[#allocation2 + $0x30] sm:$0xff] %v186_v21 }
  0xb8   :  { %277 = vst [vmem:[#allocation2 + $0x70] sm:$0xff] %v210_v22  ;;  %v233_v23 = vpop.f32.mrf.mxu2  ;;  %v257_v24 = vpop.f32.mrf.mxu3 }
  0xb9   :  { %v234_v25 = vadd.f32 %v541_v34, %v233_v23  ;;  %v258_v26 = vadd.f32 %v541_v34, %v257_v24 }
  0xbb   :  { %285 = vst [vmem:[#allocation2 + $0xb0] sm:$0xff] %v234_v25 }
  0xbc   :  { %293 = vst [vmem:[#allocation2 + $0xf0] sm:$0xff] %v258_v26  ;;  %v188_v27 = vpop.f32.mrf.mxu0  ;;  %v212_v28 = vpop.f32.mrf.mxu1 }
  0xbd   :  { %v189_v29 = vadd.f32 %v541_v34, %v188_v27  ;;  %v213_v30 = vadd.f32 %v541_v34, %v212_v28 }
  0xbf   :  { %270 = vst [vmem:[#allocation2 + $0x38] sm:$0xff] %v189_v29 }
  0xc0   :  { %278 = vst [vmem:[#allocation2 + $0x78] sm:$0xff] %v213_v30  ;;  %v236_v31 = vpop.f32.mrf.mxu2  ;;  %v260_v32 = vpop.f32.mrf.mxu3 }
  0xc1   :  { %v237_v33 = vadd.f32 %v541_v34, %v236_v31  ;;  %v261_v35 = vadd.f32 %v541_v34, %v260_v32 }
  0xc3   :  { %286 = vst [vmem:[#allocation2 + $0xb8] sm:$0xff] %v237_v33 }
  0xc4   :  { %294 = vst [vmem:[#allocation2 + $0xf8] sm:$0xff] %v261_v35 }
  0xc5   :  { %307 = dma.vmem_to_hbm [thread:$0]  %s300_s2, 4096, %s302_s27, [#allocation3], %s382_s28, %s382_s28, %s383_s29  }
  0xc6   :  { %379 = dma.done.wait [#allocation3], 4096  }
  0xc7   :  { %380 = vsyncadd [#allocation3], 4294963200 }
  0xc8   :  { %312 = vsyncpa [#allocation3], 1 }

</bundles_post_ra>
